<compile_context>
chip_gen: v6e
topology: v6e:2x2x1
jax: 0.10.0
libtpu: 0.0.40
codegen_flags: <defaults>
</compile_context>

<pallas_src>
import jax
import jax.numpy as jnp
from jax.experimental import pallas as pl
from jax.experimental.pallas import tpu as pltpu


def _identity_dma_kernel(x_hbm, o_hbm, sem):
    # Single HBM -> HBM DMA of the whole array: no VMEM bounce, no vector
    # load/store body, works for any shape / dtype / alignment.
    cp = pltpu.make_async_copy(x_hbm, o_hbm, sem)
    cp.start()
    cp.wait()


def _pallas_identity(x):
    return pl.pallas_call(
        _identity_dma_kernel,
        out_shape=jax.ShapeDtypeStruct(x.shape, x.dtype),
        in_specs=[pl.BlockSpec(memory_space=pl.ANY)],   # raw HBM ref, no auto-DMA
        out_specs=pl.BlockSpec(memory_space=pl.ANY),    # raw HBM ref, written by DMA
        scratch_shapes=[pltpu.SemaphoreType.DMA(())],
        compiler_params=pltpu.CompilerParams(has_side_effects=True),
    )(x)


@jax.jit
def _forward_impl(hist):
    # Identity forward (Policy.__call__ semantics). The optimal production
    # path would be `return hist` (zero HBM traffic); the Pallas path below
    # is the minimal-cost kernel form: one DMA-engine HBM->HBM transfer.
    return _pallas_identity(hist)


def model_forward(hist: jax.Array) -> jax.Array:
    """Identity forward pass (Policy.__call__ semantics) via a Pallas kernel."""
    return _forward_impl(hist)


class Policy:
    def __init__(self, model):
        self.model = model

    def __call__(self, obs):
        # Reference Policy returns obs unchanged; route through the kernel.
        return model_forward(obs)


class Model:
    def __init__(self):
        # Reference Model defines no parameters.
        pass

    def forward(self, hist):
        return model_forward(hist)

    def policy(self):
        return Policy(self)


if __name__ == "__main__":
    key = jax.random.PRNGKey(0)
    B, T, D = 2, 8, 32
    hist = jax.random.normal(key, (B, T, D), dtype=jnp.float32)

    model = Model()
    out = jax.block_until_ready(model.forward(hist))

    # Sanity check: identity pass-through must match the input exactly.
    assert out.shape == hist.shape and out.dtype == hist.dtype
    assert bool(jnp.all(out == hist))

    # Policy path too.
    pol = model.policy()
    out2 = jax.block_until_ready(pol(hist))
    assert bool(jnp.all(out2 == hist))

    print("KERNEL_OK")
</pallas_src>

<mosaic_0001>
module attributes {stable_mosaic.version = 11 : i64} {
  func.func @_identity_dma_kernel(%arg0: memref<2x8x32xf32, #tpu.memory_space<any>>, %arg1: memref<2x8x32xf32, #tpu.memory_space<any>>, %arg2: memref<!tpu.dma_semaphore, #tpu.memory_space<semaphore_mem>>) attributes {dimension_semantics = [], scalar_prefetch = 0 : i64, scratch_operands = 1 : i64, tpu.core_type = #tpu.core_type<tc>} {
    tpu.enqueue_dma source(%arg0 : memref<2x8x32xf32, #tpu.memory_space<any>>) target(%arg1 : memref<2x8x32xf32, #tpu.memory_space<any>>) target_semaphore(%arg2 : memref<!tpu.dma_semaphore, #tpu.memory_space<semaphore_mem>>)
    tpu.wait_dma2 semaphore(%arg2 : memref<!tpu.dma_semaphore, #tpu.memory_space<semaphore_mem>>) src(%arg0 : memref<2x8x32xf32, #tpu.memory_space<any>>) dst(%arg1 : memref<2x8x32xf32, #tpu.memory_space<any>>)
    return
  }
}

</mosaic_0001>

<bundles_post_ra>
// kernel: _forward_impl.1
= control target key start
LH: loop header
LB: loop body
LE: loop exit
PB: predicated region body
PF: predicated region fallthrough
CT: control target
= control target key end

     0   :  { %s29_s6 = smov [#allocation2]   ;;  %s30_s7 = smov 131072   ;;  %s48_s0 = inlined_call_operand.hbm [shape: f32[2,8,32], index: 0, kind: input, shape index: {}]   ;;  %s49_s1 = inlined_call_operand.hbm [shape: f32[2,8,32], index: 1, kind: output, shape index: {}]  }
   0x1   :  { %s31_s8 = smov 0  }
   0x2   :  { %12 = dma.general %s48_s0, 256, %s49_s1, %s29_s6, %s30_s7, [#allocation4], %s31_s8, 0  }
   0x3   :  { %27 = dma.done.wait [#allocation2], 256 }
   0x4   :  { %28 = vsyncadd [#allocation2], 4294967040 }
   0x5   :  { %17 = vsyncmov [#allocation2] }
   0x8   :  { %s18_s13 = vpop.sfrf %17 }
   0x9   :  { %p23_p0 = scmp.ne.s32.totalorder %s18_s13, 0 }
   0xb   :  { %22 = shalt.err (%p23_p0)  }

</bundles_post_ra>
